<compile_context>
chip_gen: v7x
topology: tpu7x:2x2x1
jax: 0.10.0
libtpu: 0.0.40
codegen_flags: <defaults>
</compile_context>

<pallas_src>
import math
import jax
import jax.numpy as jnp
from jax import lax
from jax.experimental import pallas as pl
from jax.experimental.pallas import tpu as pltpu

INPUT_DIMS = 4
N_RBF = 5                        # n_neurons_per_input
RBF_LO, RBF_HI = -1.0, 1.0
SIGMA = 1.0
HIDDEN = (64, 128)
OUTPUT_DIMS = 2
N_RBF_OUT = INPUT_DIMS * N_RBF   # 20

LANE = 128                       # vreg lane width
TILE_B_MAX = 8192                # ~11 MiB of intermediates per tile; fits v7x's
                                 # 64 MiB VMEM with headroom, good on v5e/v6e


def _qnet_kernel(x_ref, g_ref, c_ref,
                 w1_ref, b1_ref, w2_ref, b2_ref, w3_ref, b3_ref,
                 o_ref):
    """x is batch-on-sublane (TB, 4); everything downstream is
    feature-on-sublane / batch-on-lane:
       phi (20, TB) -> h1 (64, TB) -> h2 (128, TB) -> out (2, TB).
    Weights w1/w2/w3 arrive in bf16 (PyTorch (out, in) layout); biases and the
    RBF constants stay f32."""
    inv_two_sigma_sq = 1.0 / (2.0 * SIGMA * SIGMA)

    x = x_ref[...]                                                     # (TB, 4) f32

    # Transpose + 4->20 replication fused into one MXU op:
    #   rep[i*5 + j, b] = x[b, i]   (one-hot G, contraction over features).
    rep = lax.dot_general(g_ref[...], x, (((1,), (1,)), ((), ())),
                          preferred_element_type=jnp.float32)          # (20, TB)

    # Gaussian RBF expansion (EUP exp + VPU elementwise), lane-dense, f32.
    phi = jnp.exp(-jnp.square(rep - c_ref[...]) * inv_two_sigma_sq)    # (20, TB)

    # Hidden layer 1: Linear(20 -> 64) + ReLU.  bf16 operands, f32 accumulate.
    h1 = jnp.dot(w1_ref[...], phi.astype(jnp.bfloat16),
                 preferred_element_type=jnp.float32) + b1_ref[...]
    h1 = jnp.maximum(h1, 0.0)                                          # (64, TB)

    # Hidden layer 2: Linear(64 -> 128) + ReLU.
    h2 = jnp.dot(w2_ref[...], h1.astype(jnp.bfloat16),
                 preferred_element_type=jnp.float32) + b2_ref[...]
    h2 = jnp.maximum(h2, 0.0)                                          # (128, TB)

    # Output layer: Linear(128 -> 2); store is lane-dense (2 full sublane rows).
    o_ref[...] = (jnp.dot(w3_ref[...], h2.astype(jnp.bfloat16),
                          preferred_element_type=jnp.float32)
                  + b3_ref[...])                                       # (2, TB)


def qnet_forward_pallas(x, params):
    """x: (B, INPUT_DIMS) float32. Returns (1, B, OUTPUT_DIMS) matching the
    PyTorch x.unsqueeze(0) batch convention."""
    B = x.shape[0]
    g, c, w1, b1, w2, b2, w3, b3 = params

    x = x.astype(jnp.float32)
    # One-time tiny casts: bf16 weights feed the MXU natively on v5e/v6e/v7x.
    w1b = w1.astype(jnp.bfloat16)
    w2b = w2.astype(jnp.bfloat16)
    w3b = w3.astype(jnp.bfloat16)

    # ---- batch tiling ------------------------------------------------------
    b_lane = pl.cdiv(B, LANE) * LANE
    if b_lane > LANE:
        # Cap the tile at ~half the batch so there are always >= 2 grid steps
        # (lets v7x shard the parallel axis across both TensorCores and gives
        # the auto-pipeliner something to overlap).
        half = pl.cdiv(b_lane, 2 * LANE) * LANE
        tile_b = min(TILE_B_MAX, half)
    else:
        tile_b = b_lane
    b_pad = pl.cdiv(b_lane, tile_b) * tile_b
    grid = (b_pad // tile_b,)

    if b_pad != B:
        # Only when B is not a multiple of tile_b (never for the usual
        # power-of-two training batches); padded rows are junk and their output
        # lanes are sliced away below (all ops are per-row independent).
        x = jnp.pad(x, ((0, b_pad - B), (0, 0)))

    # x/out tiled along the batch axis; weights pinned to block (0, 0) so they
    # stay VMEM-resident and are not re-DMA'd per tile.
    x_spec = pl.BlockSpec((tile_b, INPUT_DIMS), lambda i: (i, 0))
    o_spec = pl.BlockSpec((OUTPUT_DIMS, tile_b), lambda i: (0, i))

    def pinned(arr):
        return pl.BlockSpec(arr.shape, lambda i: (0, 0))

    out_t = pl.pallas_call(
        _qnet_kernel,
        out_shape=jax.ShapeDtypeStruct((OUTPUT_DIMS, b_pad), jnp.float32),
        grid=grid,
        in_specs=[x_spec,
                  pinned(g), pinned(c),
                  pinned(w1b), pinned(b1),
                  pinned(w2b), pinned(b2),
                  pinned(w3b), pinned(b3)],
        out_specs=o_spec,
        compiler_params=pltpu.CompilerParams(
            dimension_semantics=("parallel",),
            vmem_limit_bytes=48 * 1024 * 1024),
    )(x, g, c, w1b, b1, w2b, b2, w3b, b3)

    # Tiny fixup (2*B floats): drop padded lanes, (2, B) -> (B, 2), unsqueeze(0).
    return jnp.transpose(out_t[:, :B]).reshape(1, B, OUTPUT_DIMS)


def qnet_forward_reference(x, params):
    """Plain-JAX path (same math, fp32). Preferred for tiny online batches
    where the Pallas call is pure launch overhead."""
    g, c, w1, b1, w2, b2, w3, b3 = params
    phi = jnp.exp(-jnp.square(x @ g.T - c.T) / (2.0 * SIGMA * SIGMA))
    h1 = jnp.maximum(phi @ w1.T + b1.T, 0.0)
    h2 = jnp.maximum(h1 @ w2.T + b2.T, 0.0)
    out = h2 @ w3.T + b3.T
    return out[None]                                      # (1, B, 2)


def qnet_forward(x, params, min_pallas_batch=1024):
    """Dispatcher: small batches (action selection) use plain JAX; large
    training/eval batches use the Pallas kernel.  Crossover is a measured
    default; re-sweep per deployment."""
    if x.shape[0] < min_pallas_batch:
        return qnet_forward_reference(x, params)
    return qnet_forward_pallas(x, params)


def _xavier_normal(key, fan_out, fan_in):
    # Matches torch.nn.init.xavier_normal_: std = sqrt(2 / (fan_in + fan_out)).
    # Weights stored in PyTorch (out, in) layout; kernel computes W @ act.
    std = math.sqrt(2.0 / (fan_in + fan_out))
    return std * jax.random.normal(key, (fan_out, fan_in), dtype=jnp.float32)


def make_params(key):
    k1, k2, k3 = jax.random.split(key, 3)

    # One-hot replication matrix (N_RBF_OUT, INPUT_DIMS): G[i*5 + j, i] = 1
    g = jnp.repeat(jnp.eye(INPUT_DIMS, dtype=jnp.float32), N_RBF, axis=0)

    # RBF centers: center of row i*5+j is linspace(-1, 1, 5)[j], column vector
    # so it broadcasts along the lane (batch) axis inside the kernel.
    centers = jnp.linspace(RBF_LO, RBF_HI, N_RBF, dtype=jnp.float32)     # (5,)
    c = jnp.tile(centers, (INPUT_DIMS,)).reshape(N_RBF_OUT, 1)           # (20, 1)

    w1 = _xavier_normal(k1, HIDDEN[0], N_RBF_OUT)           # (64, 20)
    b1 = jnp.zeros((HIDDEN[0], 1), dtype=jnp.float32)       # zeros_ init
    w2 = _xavier_normal(k2, HIDDEN[1], HIDDEN[0])           # (128, 64)
    b2 = jnp.zeros((HIDDEN[1], 1), dtype=jnp.float32)
    w3 = _xavier_normal(k3, OUTPUT_DIMS, HIDDEN[1])         # (2, 128)
    b3 = jnp.zeros((OUTPUT_DIMS, 1), dtype=jnp.float32)

    return (g, c, w1, b1, w2, b2, w3, b3)


if __name__ == "__main__":
    key = jax.random.PRNGKey(0)
    k_params, k_x1, k_x2 = jax.random.split(key, 3)

    params = make_params(k_params)

    # Check 1: tiny batch (B=2), single grid step (the dispatcher would route
    # this to the plain-JAX path in production; we exercise the kernel directly).
    B1 = 2
    x1 = jax.random.uniform(k_x1, (B1, INPUT_DIMS), dtype=jnp.float32,
                            minval=-1.0, maxval=1.0)
    out1 = qnet_forward_pallas(x1, params)
    jax.block_until_ready(out1)
    assert out1.shape == (1, B1, OUTPUT_DIMS), out1.shape
    ref1 = qnet_forward_reference(x1, params)
    # bf16 matmul operands in the kernel vs fp32 reference -> loosened tolerance.
    assert jnp.allclose(out1, ref1, atol=2e-2, rtol=2e-2), (out1, ref1)

    # Check 2: non-multiple batch (B=300) -> exercises padding, 2 grid steps
    # and the lane slicing of the padded output.
    B2 = 300
    x2 = jax.random.uniform(k_x2, (B2, INPUT_DIMS), dtype=jnp.float32,
                            minval=-1.0, maxval=1.0)
    out2 = qnet_forward_pallas(x2, params)
    jax.block_until_ready(out2)
    assert out2.shape == (1, B2, OUTPUT_DIMS), out2.shape
    ref2 = qnet_forward_reference(x2, params)
    assert jnp.allclose(out2, ref2, atol=2e-2, rtol=2e-2)

    print("KERNEL_OK")
</pallas_src>

<mosaic_0001>
module attributes {stable_mosaic.version = 11 : i64} {
  func.func @_qnet_kernel(%arg0: i32, %arg1: memref<128x4xf32, #tpu.memory_space<vmem>>, %arg2: memref<20x4xf32, #tpu.memory_space<vmem>>, %arg3: memref<20x1xf32, #tpu.memory_space<vmem>>, %arg4: memref<64x20xbf16, #tpu.memory_space<vmem>>, %arg5: memref<64x1xf32, #tpu.memory_space<vmem>>, %arg6: memref<128x64xbf16, #tpu.memory_space<vmem>>, %arg7: memref<128x1xf32, #tpu.memory_space<vmem>>, %arg8: memref<2x128xbf16, #tpu.memory_space<vmem>>, %arg9: memref<2x1xf32, #tpu.memory_space<vmem>>, %arg10: memref<2x128xf32, #tpu.memory_space<vmem>>) attributes {dimension_semantics = [#tpu.dimension_semantics<parallel>], iteration_bounds = array<i64: 1>, scalar_prefetch = 0 : i64, scratch_operands = 0 : i64, tpu.core_type = #tpu.core_type<tc>, window_params = [{transform_indices = @transform_0, window_bounds = array<i64: 128, 4>}, {pipeline_mode = #tpu.pipeline_mode<synchronous>, transform_indices = @transform_1, window_bounds = array<i64: 20, 4>}, {pipeline_mode = #tpu.pipeline_mode<synchronous>, transform_indices = @transform_2, window_bounds = array<i64: 20, 1>}, {pipeline_mode = #tpu.pipeline_mode<synchronous>, transform_indices = @transform_3, window_bounds = array<i64: 64, 20>}, {pipeline_mode = #tpu.pipeline_mode<synchronous>, transform_indices = @transform_4, window_bounds = array<i64: 64, 1>}, {pipeline_mode = #tpu.pipeline_mode<synchronous>, transform_indices = @transform_5, window_bounds = array<i64: 128, 64>}, {pipeline_mode = #tpu.pipeline_mode<synchronous>, transform_indices = @transform_6, window_bounds = array<i64: 128, 1>}, {pipeline_mode = #tpu.pipeline_mode<synchronous>, transform_indices = @transform_7, window_bounds = array<i64: 2, 128>}, {pipeline_mode = #tpu.pipeline_mode<synchronous>, transform_indices = @transform_8, window_bounds = array<i64: 2, 1>}, {transform_indices = @transform_9, window_bounds = array<i64: 2, 128>}]} {
    %c0 = arith.constant 0 : index
    %c0_0 = arith.constant 0 : index
    %0 = vector.load %arg1[%c0, %c0_0] : memref<128x4xf32, #tpu.memory_space<vmem>>, vector<128x4xf32>
    %c0_1 = arith.constant 0 : index
    %c0_2 = arith.constant 0 : index
    %1 = vector.load %arg2[%c0_1, %c0_2] : memref<20x4xf32, #tpu.memory_space<vmem>>, vector<20x4xf32>
    %cst = arith.constant dense<0.000000e+00> : vector<20x128xf32>
    %2 = tpu.matmul %1, %0, %cst {dimension_numbers = #tpu.dot_dimension_numbers<[1], [1], [0], [0], [0, 0, 1, 0], [], []>} : vector<20x4xf32>, vector<128x4xf32>, vector<20x128xf32> -> vector<20x128xf32>
    %c0_3 = arith.constant 0 : index
    %c0_4 = arith.constant 0 : index
    %3 = vector.load %arg3[%c0_3, %c0_4] : memref<20x1xf32, #tpu.memory_space<vmem>>, vector<20x1xf32>
    %4 = vector.broadcast %3 : vector<20x1xf32> to vector<20x128xf32>
    %5 = arith.subf %2, %4 : vector<20x128xf32>
    %6 = arith.mulf %5, %5 : vector<20x128xf32>
    %cst_5 = arith.constant 0.000000e+00 : f32
    %7 = vector.broadcast %cst_5 : f32 to vector<20x128xf32>
    %8 = arith.subf %7, %6 : vector<20x128xf32>
    %cst_6 = arith.constant 5.000000e-01 : f32
    %9 = vector.broadcast %cst_6 : f32 to vector<20x128xf32>
    %10 = arith.mulf %8, %9 : vector<20x128xf32>
    %11 = math.exp %10 : vector<20x128xf32>
    %c0_7 = arith.constant 0 : index
    %c0_8 = arith.constant 0 : index
    %12 = vector.load %arg4[%c0_7, %c0_8] : memref<64x20xbf16, #tpu.memory_space<vmem>>, vector<64x20xbf16>
    %13 = arith.truncf %11 : vector<20x128xf32> to vector<20x128xbf16>
    %cst_9 = arith.constant dense<0.000000e+00> : vector<64x128xf32>
    %14 = tpu.matmul %12, %13, %cst_9 {dimension_numbers = #tpu.dot_dimension_numbers<[1], [0], [0], [1], [0, 0, 1, 1], [], []>} : vector<64x20xbf16>, vector<20x128xbf16>, vector<64x128xf32> -> vector<64x128xf32>
    %c0_10 = arith.constant 0 : index
    %c0_11 = arith.constant 0 : index
    %15 = vector.load %arg5[%c0_10, %c0_11] : memref<64x1xf32, #tpu.memory_space<vmem>>, vector<64x1xf32>
    %16 = vector.broadcast %15 : vector<64x1xf32> to vector<64x128xf32>
    %17 = arith.addf %14, %16 : vector<64x128xf32>
    %cst_12 = arith.constant 0.000000e+00 : f32
    %18 = vector.broadcast %cst_12 : f32 to vector<64x128xf32>
    %19 = arith.maximumf %17, %18 : vector<64x128xf32>
    %c0_13 = arith.constant 0 : index
    %c0_14 = arith.constant 0 : index
    %20 = vector.load %arg6[%c0_13, %c0_14] : memref<128x64xbf16, #tpu.memory_space<vmem>>, vector<128x64xbf16>
    %21 = arith.truncf %19 : vector<64x128xf32> to vector<64x128xbf16>
    %cst_15 = arith.constant dense<0.000000e+00> : vector<128x128xf32>
    %22 = tpu.matmul %20, %21, %cst_15 {dimension_numbers = #tpu.dot_dimension_numbers<[1], [0], [0], [1], [0, 0, 1, 1], [], []>} : vector<128x64xbf16>, vector<64x128xbf16>, vector<128x128xf32> -> vector<128x128xf32>
    %c0_16 = arith.constant 0 : index
    %c0_17 = arith.constant 0 : index
    %23 = vector.load %arg7[%c0_16, %c0_17] : memref<128x1xf32, #tpu.memory_space<vmem>>, vector<128x1xf32>
    %24 = vector.broadcast %23 : vector<128x1xf32> to vector<128x128xf32>
    %25 = arith.addf %22, %24 : vector<128x128xf32>
    %cst_18 = arith.constant 0.000000e+00 : f32
    %26 = vector.broadcast %cst_18 : f32 to vector<128x128xf32>
    %27 = arith.maximumf %25, %26 : vector<128x128xf32>
    %c0_19 = arith.constant 0 : index
    %c0_20 = arith.constant 0 : index
    %28 = vector.load %arg8[%c0_19, %c0_20] : memref<2x128xbf16, #tpu.memory_space<vmem>>, vector<2x128xbf16>
    %29 = arith.truncf %27 : vector<128x128xf32> to vector<128x128xbf16>
    %cst_21 = arith.constant dense<0.000000e+00> : vector<2x128xf32>
    %30 = tpu.matmul %28, %29, %cst_21 {dimension_numbers = #tpu.dot_dimension_numbers<[1], [0], [0], [1], [0, 0, 1, 1], [], []>} : vector<2x128xbf16>, vector<128x128xbf16>, vector<2x128xf32> -> vector<2x128xf32>
    %c0_22 = arith.constant 0 : index
    %c0_23 = arith.constant 0 : index
    %31 = vector.load %arg9[%c0_22, %c0_23] : memref<2x1xf32, #tpu.memory_space<vmem>>, vector<2x1xf32>
    %32 = vector.broadcast %31 : vector<2x1xf32> to vector<2x128xf32>
    %33 = arith.addf %30, %32 : vector<2x128xf32>
    %c0_24 = arith.constant 0 : index
    %c0_25 = arith.constant 0 : index
    %34 = vector.load %arg10[%c0_24, %c0_25] : memref<2x128xf32, #tpu.memory_space<vmem>>, vector<2x128xf32>
    tpu.vector_store %arg10[%c0_24, %c0_25], %33 {strides = array<i32>} : memref<2x128xf32, #tpu.memory_space<vmem>>, vector<2x128xf32>,
    return
  }
  func.func @transform_0(%arg0: i32) -> (i32, i32) {
    %c0_i32 = arith.constant 0 : i32
    %c0_i32_0 = arith.constant 0 : i32
    return %arg0, %c0_i32 : i32, i32
  }
  func.func @transform_1(%arg0: i32) -> (i32, i32) {
    %c0_i32 = arith.constant 0 : i32
    %c0_i32_0 = arith.constant 0 : i32
    %c0_i32_1 = arith.constant 0 : i32
    return %c0_i32, %c0_i32_0 : i32, i32
  }
  func.func @transform_2(%arg0: i32) -> (i32, i32) {
    %c0_i32 = arith.constant 0 : i32
    %c0_i32_0 = arith.constant 0 : i32
    %c0_i32_1 = arith.constant 0 : i32
    return %c0_i32, %c0_i32_0 : i32, i32
  }
  func.func @transform_3(%arg0: i32) -> (i32, i32) {
    %c0_i32 = arith.constant 0 : i32
    %c0_i32_0 = arith.constant 0 : i32
    %c0_i32_1 = arith.constant 0 : i32
    return %c0_i32, %c0_i32_0 : i32, i32
  }
  func.func @transform_4(%arg0: i32) -> (i32, i32) {
    %c0_i32 = arith.constant 0 : i32
    %c0_i32_0 = arith.constant 0 : i32
    %c0_i32_1 = arith.constant 0 : i32
    return %c0_i32, %c0_i32_0 : i32, i32
  }
  func.func @transform_5(%arg0: i32) -> (i32, i32) {
    %c0_i32 = arith.constant 0 : i32
    %c0_i32_0 = arith.constant 0 : i32
    %c0_i32_1 = arith.constant 0 : i32
    return %c0_i32, %c0_i32_0 : i32, i32
  }
  func.func @transform_6(%arg0: i32) -> (i32, i32) {
    %c0_i32 = arith.constant 0 : i32
    %c0_i32_0 = arith.constant 0 : i32
    %c0_i32_1 = arith.constant 0 : i32
    return %c0_i32, %c0_i32_0 : i32, i32
  }
  func.func @transform_7(%arg0: i32) -> (i32, i32) {
    %c0_i32 = arith.constant 0 : i32
    %c0_i32_0 = arith.constant 0 : i32
    %c0_i32_1 = arith.constant 0 : i32
    return %c0_i32, %c0_i32_0 : i32, i32
  }
  func.func @transform_8(%arg0: i32) -> (i32, i32) {
    %c0_i32 = arith.constant 0 : i32
    %c0_i32_0 = arith.constant 0 : i32
    %c0_i32_1 = arith.constant 0 : i32
    return %c0_i32, %c0_i32_0 : i32, i32
  }
  func.func @transform_9(%arg0: i32) -> (i32, i32) {
    %c0_i32 = arith.constant 0 : i32
    %c0_i32_0 = arith.constant 0 : i32
    return %c0_i32, %arg0 : i32, i32
  }
}

</mosaic_0001>

<bundles_post_ra>
// kernel: tpu_custom_call.1
= control target key start
LH: loop header
LB: loop body
LE: loop exit
PB: predicated region body
PF: predicated region fallthrough
CT: control target
= control target key end

     0   :  { %vm53_vm0 = vcmask 31744   ;;  %v1027_v2 = vmov 0.0|0.0   ;;  %vm1028_vm2 = vmmov 0   ;;  %v1029_v5 = vmov 0.0   ;;  %s1335_s0 = inlined_call_operand.vmem [shape: f32[128,4], index: 0, kind: input, shape index: {}]   ;;  %s1336_s1 = inlined_call_operand.vmem [shape: f32[20,4], index: 1, kind: input, shape index: {}]   ;;  %s1337_s2 = inlined_call_operand.vmem [shape: f32[20,1], index: 2, kind: input, shape index: {}]   ;;  %s1338_s3 = inlined_call_operand.vmem [shape: bf16[64,20], index: 3, kind: input, shape index: {}]   ;;  %s1339_s4 = inlined_call_operand.vmem [shape: f32[64,1], index: 4, kind: input, shape index: {}]   ;;  %s1340_s5 = inlined_call_operand.vmem [shape: bf16[128,64], index: 5, kind: input, shape index: {}]   ;;  %s1341_s6 = inlined_call_operand.vmem [shape: f32[128,1], index: 6, kind: input, shape index: {}]   ;;  %s1342_s7 = inlined_call_operand.vmem [shape: bf16[2,128], index: 7, kind: input, shape index: {}]   ;;  %s1343_s8 = inlined_call_operand.vmem [shape: f32[2,1], index: 8, kind: input, shape index: {}]   ;;  %s1344_s9 = inlined_call_operand.hbm [shape: f32[2,128], index: 9, kind: output, shape index: {}]  }
   0x1   :  { %v34_v0 = vld [vmem:[%s1335_s0] sm:$0xff]  ;;  %v35_v1 = vld [vmem:[%s1335_s0 + $0x8] sm:$0xff]  ;;  %945 = vmatprep.subr.bf16.mxu0 %v1027_v2  ;;  %vm1091_vm1 = vmpackc.low %vm53_vm0, %vm53_vm0  ;;  %880 = vmatprep.mubr.msk.f32.mxu0 %vm1028_vm2, %v1029_v5  ;;  %v1030_v6 = vmov 0  }
   0x2   :  { %v946_v3 = vpack.c.bf16 %v35_v1, %v34_v0  ;;  %983 = vset.pattern.permute.xlu0 %v1030_v6  ;;  %984 = vset.pattern.permute.xlu1 %v1030_v6  ;;  %v36_v7 = vld [vmem:[%s1335_s0 + $0x10] sm:$0xff]  ;;  %v37_v8 = vld [vmem:[%s1335_s0 + $0x18] sm:$0xff]  ;;  %v191_v9 = vld [vmem:[%s1337_s2] sm:$0xff] }
   0x3   :  { %v950_v10 = vpack.c.bf16 %v37_v8, %v36_v7  ;;  %196 = vperm.xlu0 %983, %v191_v9   ;;  %v193_v11 = vld [vmem:[%s1337_s2 + $0x10] sm:$0xf]  ;;  %v192_v12 = vld [vmem:[%s1337_s2 + $0x8] sm:$0xff]  ;;  %v237_v13 = vld [vmem:[%s1339_s4] sm:$0xff] }
   0x4   :  { %948 = vmatpush3.bf16.xpose.msk.msra.mxu0 %vm1091_vm1, %v946_v3  ;;  %206 = vperm.xlu1 %984, %v193_v11   ;;  %v38_v14 = vld [vmem:[%s1335_s0 + $0x20] sm:$0xff]  ;;  %v39_v15 = vld [vmem:[%s1335_s0 + $0x28] sm:$0xff]  ;;  %v239_v17 = vld [vmem:[%s1339_s4 + $0x10] sm:$0xff] }
   0x5   :  { %949 = vmatprep.subr.bf16.mxu0 %v1027_v2  ;;  %v238_v16 = vld [vmem:[%s1339_s4 + $0x8] sm:$0xff]  ;;  %v954_v18 = vpack.c.bf16 %v39_v15, %v38_v14  ;;  %v240_v19 = vld [vmem:[%s1339_s4 + $0x18] sm:$0xff]  ;;  %v241_v20 = vld [vmem:[%s1339_s4 + $0x20] sm:$0xff] }
   0x6   :  { %v40_v21 = vld [vmem:[%s1335_s0 + $0x30] sm:$0xff]  ;;  %v41_v22 = vld [vmem:[%s1335_s0 + $0x38] sm:$0xff]  ;;  %v242_v23 = vld [vmem:[%s1339_s4 + $0x28] sm:$0xff] }
   0x7   :  { %201 = vperm.xlu0 %983, %v192_v12   ;;  %v243_v24 = vld [vmem:[%s1339_s4 + $0x30] sm:$0xff]  ;;  %v958_v25 = vpack.c.bf16 %v41_v22, %v40_v21  ;;  %v244_v26 = vld [vmem:[%s1339_s4 + $0x38] sm:$0xff] }
   0x8   :  { %247 = vperm.xlu1 %984, %v237_v13  }
   0xb   :  { %252 = vperm.xlu0 %983, %v238_v16  }
   0xc   :  { %952 = vmatpush3.bf16.xpose.msk.msra.mxu0 %vm1091_vm1, %v950_v10  ;;  %257 = vperm.xlu1 %984, %v239_v17  }
   0xd   :  { %953 = vmatprep.subr.bf16.mxu0 %v1027_v2 }
   0xf   :  { %262 = vperm.xlu0 %983, %v240_v19  }
  0x10   :  { %267 = vperm.xlu1 %984, %v241_v20  }
  0x13   :  { %272 = vperm.xlu0 %983, %v242_v23  }
  0x14   :  { %956 = vmatpush3.bf16.xpose.msk.msra.mxu0 %vm1091_vm1, %v954_v18  ;;  %277 = vperm.xlu1 %984, %v243_v24  }
  0x15   :  { %957 = vmatprep.subr.bf16.mxu0 %v1027_v2 }
  0x16   :  { %14 = vsyncpa [#allocation3], 0  ;;  %v415_v27 = vld [vmem:[%s1341_s6] sm:$0xff]  ;;  %v43_v29 = vld [vmem:[%s1335_s0 + $0x48] sm:$0xff]  ;;  %vm305_vm3 = vcmask 162816   ;;  %vm318_vm4 = vcmask 1041408  }
  0x17   :  { %282 = vperm.xlu0 %983, %v244_v26   ;;  %v42_v28 = vld [vmem:[%s1335_s0 + $0x40] sm:$0xff]  ;;  %v416_v30 = vld [vmem:[%s1341_s6 + $0x8] sm:$0xff]  ;;  %v417_v31 = vld [vmem:[%s1341_s6 + $0x10] sm:$0xff]  ;;  %vm551_vm5 = vcmask 523264   ;;  %s1031_s29 = smov [#allocation2]  }
  0x18   :  { %433 = vperm.xlu1 %984, %v415_v27   ;;  %v962_v32 = vpack.c.bf16 %v43_v29, %v42_v28  ;;  %v418_v33 = vld [vmem:[%s1341_s6 + $0x18] sm:$0xff]  ;;  %v419_v34 = vld [vmem:[%s1341_s6 + $0x20] sm:$0xff]  ;;  %v44_v35 = vld [vmem:[%s1335_s0 + $0x50] sm:$0xff] }
  0x19   :  { %v45_v36 = vld [vmem:[%s1335_s0 + $0x58] sm:$0xff]  ;;  %v420_v37 = vld [vmem:[%s1341_s6 + $0x28] sm:$0xff]  ;;  %v421_v38 = vld [vmem:[%s1341_s6 + $0x30] sm:$0xff] }
  0x1a   :  { %v966_v39 = vpack.c.bf16 %v45_v36, %v44_v35  ;;  %v422_v40 = vld [vmem:[%s1341_s6 + $0x38] sm:$0xff]  ;;  %v423_v41 = vld [vmem:[%s1341_s6 + $0x40] sm:$0xff]  ;;  %v47_v43 = vld [vmem:[%s1335_s0 + $0x68] sm:$0xff] }
  0x1b   :  { %438 = vperm.xlu0 %983, %v416_v30   ;;  %v46_v42 = vld [vmem:[%s1335_s0 + $0x60] sm:$0xff]  ;;  %v424_v44 = vld [vmem:[%s1341_s6 + $0x48] sm:$0xff]  ;;  %v425_v45 = vld [vmem:[%s1341_s6 + $0x50] sm:$0xff] }
  0x1c   :  { %960 = vmatpush3.bf16.xpose.msk.msra.mxu0 %vm1091_vm1, %v958_v25  ;;  %443 = vperm.xlu1 %984, %v417_v31   ;;  %v970_v46 = vpack.c.bf16 %v47_v43, %v46_v42  ;;  %v426_v47 = vld [vmem:[%s1341_s6 + $0x58] sm:$0xff]  ;;  %v427_v48 = vld [vmem:[%s1341_s6 + $0x60] sm:$0xff]  ;;  %v48_v49 = vld [vmem:[%s1335_s0 + $0x70] sm:$0xff] }
  0x1d   :  { %961 = vmatprep.subr.bf16.mxu0 %v1027_v2  ;;  %v49_v50 = vld [vmem:[%s1335_s0 + $0x78] sm:$0xff]  ;;  %v428_v51 = vld [vmem:[%s1341_s6 + $0x68] sm:$0xff]  ;;  %v429_v52 = vld [vmem:[%s1341_s6 + $0x70] sm:$0xff] }
  0x1e   :  { %v974_v53 = vpack.c.bf16 %v49_v50, %v48_v49  ;;  %v430_v54 = vld [vmem:[%s1341_s6 + $0x78] sm:$0xff]  ;;  %v698_v55 = vld [vmem:[%s1343_s8] sm:$0x3]  ;;  %v51_v57 = vld [vmem:[%s1336_s1 + $0x8] sm:$0xff]  ;;  %s751_s8 = sshll.u32 %s1031_s29, 4  ;;  %s752_s8 = int_to_ptr.vmem [resolvable:$true] %s751_s8 }
  0x1f   :  { %448 = vperm.xlu0 %983, %v418_v33   ;;  %v50_v56 = vld [vmem:[%s1336_s1] sm:$0xff]  ;;  %v52_v58 = vld [vmem:[%s1336_s1 + $0x10] sm:$0xf]  ;;  %v986_v27 = vld [vmem:[%s1338_s3 + $0x8] sm:$0xff]   ;;  %s1003_s4 = scalar_lea.vmem %s752_s8, 32  ;;  %p1008_p1 = scmp.lt.s32.totalorder %s752_s8, %s752_s8 }
  0x20   :  { %453 = vperm.xlu1 %984, %v419_v34   ;;  %v985_v59 = vld [vmem:[%s1338_s3] sm:$0xff]   ;;  %v987_v28 = vld [vmem:[%s1338_s3 + $0x10] sm:$0xff]   ;;  %v988_v29 = vld [vmem:[%s1338_s3 + $0x18] sm:$0xff]   ;;  %p1004_p0 = scmp.ne.s32.totalorder %s752_s8, %s1003_s4  ;;  %p1009_p2 = scmp.lt.s32.totalorder %s1003_s4, %s1003_s4 }
  0x21   :  { %893 = vmatprep.mubr.msk.bf16.mxu1 %vm305_vm3, %v985_v59  ;;  %v989_v30 = vld [vmem:[%s1340_s5] sm:$0xff]  }
  0x22   :  { %p1010_p3 = por %p1009_p2, %p1008_p1 }
  0x23   :  { %458 = vperm.xlu0 %983, %v420_v37  }
  0x24   :  { %964 = vmatpush3.bf16.xpose.msk.msra.mxu0 %vm1091_vm1, %v962_v32  ;;  %463 = vperm.xlu1 %984, %v421_v38   ;;  %p1011_p4 = pnand %p1010_p3, %p1004_p0 }
  0x25   :  { %965 = vmatprep.subr.bf16.mxu0 %v1027_v2 }
  0x27   :  { %468 = vperm.xlu0 %983, %v422_v40  }
  0x28   :  { %473 = vperm.xlu1 %984, %v423_v41  }
  0x2b   :  { %478 = vperm.xlu0 %983, %v424_v44  }
  0x2c   :  { %968 = vmatpush3.bf16.xpose.msk.msra.mxu0 %vm1091_vm1, %v966_v39  ;;  %483 = vperm.xlu1 %984, %v425_v45  }
  0x2d   :  { %969 = vmatprep.subr.bf16.mxu0 %v1027_v2 }
  0x2f   :  { %488 = vperm.xlu0 %983, %v426_v47  }
  0x30   :  { %493 = vperm.xlu1 %984, %v427_v48  }
  0x33   :  { %498 = vperm.xlu0 %983, %v428_v51  }
  0x34   :  { %972 = vmatpush3.bf16.xpose.msk.msra.mxu0 %vm1091_vm1, %v970_v46  ;;  %503 = vperm.xlu1 %984, %v429_v52  }
  0x35   :  { %973 = vmatprep.subr.bf16.mxu0 %v1027_v2 }
  0x37   :  { %508 = vperm.xlu0 %983, %v430_v54  }
  0x38   :  { %701 = vperm.xlu1 %984, %v698_v55  }
  0x3c   :  { %976 = vmatpush3.bf16.xpose.msk.msra.mxu0 %vm1091_vm1, %v974_v53 }
  0x43   :  { %881 = vmatmul.mubr.msk.f32.vlgmr.msra.gmra.mrb[0].mxu0 %vm53_vm0, %v50_v56 }
  0x44   :  { %883 = vmatprep.mubr.msk.f32.mxu0 %vm1028_vm2, %v1029_v5 }
  0x47   :  { %884 = vmatmul.mubr.msk.f32.gmra.mrb[2].mxu0 %vm53_vm0, %v51_v57 }
  0x48   :  { %886 = vmatprep.mubr.msk.f32.mxu0 %vm1028_vm2, %v1029_v5 }
  0x4b   :  { %887 = vmatmul.mubr.msk.f32.gmra.mrb[4].mxu0 %vm53_vm0, %v52_v58 }
  0x82   :  { %v197_v60 = vpop.permute.xlu0 %196 }
  0x83   :  { %v207_v9 = vpop.permute.xlu1 %206 }
  0x86   :  { %v202_v1 = vpop.permute.xlu0 %201 }
  0x87   :  { %v248_v31 = vpop.permute.xlu1 %247 }
  0x8a   :  { %v253_v32 = vpop.permute.xlu0 %252 }
  0x8b   :  { %v258_v33 = vpop.permute.xlu1 %257 }
  0x8e   :  { %v263_v34 = vpop.permute.xlu0 %262 }
  0x8f   :  { %v268_v38 = vpop.permute.xlu1 %267 }
  0x92   :  { %v273_v43 = vpop.permute.xlu0 %272 }
  0x93   :  { %v278_v50 = vpop.permute.xlu1 %277 }
  0x96   :  { %v283_v55 = vpop.permute.xlu0 %282 }
 0x116   :  { %v177_v61 = vpop.f32.mrb[0].mxu0 }
 0x117   :  { %v209_v62 = vsub.f32 %v177_v61, %v197_v60  ;;  %v882_v63 = vpop.f32.mrb[1].mxu0 }
 0x119   :  { %v212_v0 = vmul.f32 %v209_v62, %v209_v62 }
 0x11a   :  { %v182_v2 = vpop.f32.mrb[2].mxu0 }
 0x11b   :  { %v215_v3 = vsub.f32 0.0, %v212_v0  ;;  %v210_v4 = vsub.f32 %v182_v2, %v202_v1  ;;  %v885_v6 = vpop.f32.mrb[3].mxu0 }
 0x11c   :  { %v992_v6 = vld [vmem:[%s1340_s5 + $0x18] sm:$0xff]  }
 0x11d   :  { %v218_v7 = vmul.f32 0.5, %v215_v3  ;;  %v213_v8 = vmul.f32 %v210_v4, %v210_v4  ;;  %v990_v3 = vld [vmem:[%s1340_s5 + $0x8] sm:$0xff]   ;;  %v991_v4 = vld [vmem:[%s1340_s5 + $0x10] sm:$0xff]  }
 0x11e   :  { %v187_v10 = vpop.f32.mrb[4].mxu0 }
 0x11f   :  { %v216_v11 = vsub.f32 0.0, %v213_v8  ;;  %v211_v12 = vsub.f32 %v187_v10, %v207_v9  ;;  %v888_v13 = vpop.f32.mrb[5].mxu0  ;;  %v221_v14 = vmul.f32 1.442695, %v218_v7  ;;  %v993_v7 = vld [vmem:[%s1340_s5 + $0x20] sm:$0xff]   ;;  %v994_v8 = vld [vmem:[%s1340_s5 + $0x28] sm:$0xff]  }
 0x120   :  { %v995_v9 = vld [vmem:[%s1340_s5 + $0x30] sm:$0xff]   ;;  %v996_v10 = vld [vmem:[%s1340_s5 + $0x38] sm:$0xff]  }
 0x121   :  { %v219_v15 = vmul.f32 0.5, %v216_v11  ;;  %v214_v16 = vmul.f32 %v211_v12, %v211_v12  ;;  %997 = vpow2.f32 %v221_v14  ;;  %v434_v11 = vpop.permute.xlu1 %433  ;;  %v439_v12 = vpop.permute.xlu0 %438 }
 0x123   :  { %v223_v17 = vmul.f32 1.442695, %v219_v15  ;;  %v217_v18 = vsub.f32 0.0, %v214_v16 }
 0x125   :  { %999 = vpow2.f32 %v223_v17  ;;  %v220_v19 = vmul.f32 0.5, %v217_v18  ;;  %v444_v13 = vpop.permute.xlu1 %443  ;;  %v449_v14 = vpop.permute.xlu0 %448 }
 0x127   :  { %v225_v20 = vmul.f32 1.442695, %v220_v19 }
 0x129   :  { %1001 = vpow2.f32 %v225_v20  ;;  %v454_v15 = vpop.permute.xlu1 %453  ;;  %v459_v16 = vpop.permute.xlu0 %458 }
 0x12b   :  { %v998_v21 = vpop.eup %997 }
 0x12d   :  { %v464_v17 = vpop.permute.xlu1 %463 }
 0x12f   :  { %v1000_v22 = vpop.eup %999 }
 0x130   :  { %v235_v23 = vpack.c.bf16 %v1000_v22, %v998_v21  ;;  %v469_v21 = vpop.permute.xlu0 %468 }
 0x132   :  { %889 = vmatprep.subr.bf16.mxu1 %v235_v23 }
 0x133   :  { %v1002_v24 = vpop.eup %1001  ;;  %890 = vmatpush3.bf16.msra.mxu1 %v235_v23 }
 0x134   :  { %v236_v25 = vpack.c.bf16 %v1002_v24, %v1002_v24 }
 0x136   :  { %977 = vmatprep.subr.msk.bf16.mxu1 %vm318_vm4, %v236_v25  ;;  %v320_v26 = vsel %vm318_vm4, %v236_v25, 0 }
 0x137   :  { %892 = vmatpush3.bf16.msra.mxu1 %v320_v26 }
 0x13a   :  { %894 = vmatmul.mubr.msk.bf16.vlgmr.msra.gmra.mrb[0].mxu1 %vm305_vm3, %v986_v27 }
 0x13b   :  { %897 = vmatprep.mubr.msk.bf16.mxu1 %vm305_vm3, %v987_v28 }
 0x142   :  { %898 = vmatmul.mubr.msk.bf16.gmra.mrb[4].mxu1 %vm305_vm3, %v988_v29  ;;  %v474_v29 = vpop.permute.xlu1 %473 }
 0x143   :  { %909 = vmatprep.mubr.msk.bf16.mxu1 %vm551_vm5, %v989_v30 }
 0x20d   :  { %v895_v35 = vpop.f32.mrb[0].mxu1 }
 0x20e   :  { %v365_v36 = vadd.f32 %v895_v35, %v258_v33  ;;  %v356_v37 = vpop.f32.mrb[1].mxu1  ;;  %v479_v33 = vpop.permute.xlu0 %478 }
 0x20f   :  { %v357_v39 = vadd.f32 %v356_v37, %v248_v31  ;;  %v896_v40 = vpop.f32.mrb[2].mxu1 }
 0x210   :  { %v368_v41 = vadd.f32 %v896_v40, %v263_v34  ;;  %v359_v42 = vpop.f32.mrb[3].mxu1  ;;  %v389_v45 = vmax.f32 %v365_v36, 0.0 }
 0x211   :  { %v360_v44 = vadd.f32 %v359_v42, %v253_v32  ;;  %v387_v47 = vmax.f32 %v357_v39, 0.0  ;;  %v484_v42 = vpop.permute.xlu1 %483 }
 0x212   :  { %v390_v46 = vmax.f32 %v368_v41, 0.0 }
 0x213   :  { %v388_v48 = vmax.f32 %v360_v44, 0.0 }
 0x214   :  { %v412_v49 = vpack.c.bf16 %v390_v46, %v389_v45  ;;  %v489_v46 = vpop.permute.xlu0 %488 }
 0x215   :  { %v411_v51 = vpack.c.bf16 %v388_v48, %v387_v47  ;;  %v899_v52 = vpop.f32.mrb[4].mxu1 }
 0x216   :  { %v381_v53 = vadd.f32 %v899_v52, %v278_v50  ;;  %v372_v54 = vpop.f32.mrb[5].mxu1 }
 0x217   :  { %v373_v56 = vadd.f32 %v372_v54, %v268_v38  ;;  %v900_v57 = vpop.f32.mrb[6].mxu1  ;;  %901 = vmatprep.subr.bf16.mxu1 %v411_v51  ;;  %v494_v54 = vpop.permute.xlu1 %493 }
 0x218   :  { %v384_v58 = vadd.f32 %v900_v57, %v283_v55  ;;  %v375_v59 = vpop.f32.mrb[7].mxu1  ;;  %902 = vmatpush3.bf16.msra.mxu1 %v411_v51  ;;  %v393_v61 = vmax.f32 %v381_v53, 0.0 }
 0x219   :  { %v376_v60 = vadd.f32 %v375_v59, %v273_v43  ;;  %903 = vmatprep.subr.bf16.mxu1 %v412_v49  ;;  %v391_v63 = vmax.f32 %v373_v56, 0.0  ;;  %v499_v59 = vpop.permute.xlu0 %498 }
 0x21a   :  { %v394_v62 = vmax.f32 %v384_v58, 0.0 }
 0x21b   :  { %v392_v0 = vmax.f32 %v376_v60, 0.0 }
 0x21c   :  { %v414_v1 = vpack.c.bf16 %v394_v62, %v393_v61  ;;  %904 = vmatpush3.bf16.msra.mxu1 %v412_v49 }
 0x21d   :  { %v413_v2 = vpack.c.bf16 %v392_v0, %v391_v63 }
 0x21f   :  { %905 = vmatprep.subr.bf16.mxu1 %v413_v2 }
 0x220   :  { %906 = vmatpush3.bf16.msra.mxu1 %v413_v2  ;;  %v504_v2 = vpop.permute.xlu1 %503 }
 0x221   :  { %907 = vmatprep.subr.bf16.mxu1 %v414_v1 }
 0x224   :  { %908 = vmatpush3.bf16.msra.mxu1 %v414_v1 }
 0x225   :  { %925 = vmatprep.subr.bf16.mxu1 %v1029_v5 }
 0x227   :  { %910 = vmatmul.mubr.msk.bf16.vlgmr.msra.gmra.mrb[8].mxu1 %vm551_vm5, %v990_v3 }
 0x228   :  { %913 = vmatprep.mubr.msk.bf16.mxu1 %vm551_vm5, %v991_v4 }
 0x22f   :  { %914 = vmatmul.mubr.msk.bf16.gmra.mrb[12].mxu1 %vm551_vm5, %v992_v6 }
 0x230   :  { %917 = vmatprep.mubr.msk.bf16.mxu1 %vm551_vm5, %v993_v7 }
 0x237   :  { %918 = vmatmul.mubr.msk.bf16.gmra.mrb[16].mxu1 %vm551_vm5, %v994_v8  ;;  %v509_v8 = vpop.permute.xlu0 %508 }
 0x238   :  { %921 = vmatprep.mubr.msk.bf16.mxu1 %vm551_vm5, %v995_v9 }
 0x23f   :  { %922 = vmatmul.mubr.msk.bf16.gmra.mrb[20].mxu1 %vm551_vm5, %v996_v10 }
 0x240   :  { %941 = vmatprep.mubr.msk.bf16.mxu1 %vm1028_vm2, %v1029_v5 }
 0x2fa   :  { %v911_v18 = vpop.f32.mrb[8].mxu1 }
 0x2fb   :  { %v619_v19 = vadd.f32 %v911_v18, %v444_v13  ;;  %v610_v20 = vpop.f32.mrb[9].mxu1 }
 0x2fc   :  { %v611_v22 = vadd.f32 %v610_v20, %v434_v11  ;;  %v912_v23 = vpop.f32.mrb[10].mxu1  ;;  %v689_v20 = vld [vmem:[%s1342_s7] sm:$0x1] }
 0x2fd   :  { %v622_v24 = vadd.f32 %v912_v23, %v449_v14  ;;  %v613_v25 = vpop.f32.mrb[11].mxu1  ;;  %v675_v27 = vmax.f32 %v619_v19, 0.0 }
 0x2fe   :  { %v614_v26 = vadd.f32 %v613_v25, %v439_v12  ;;  %v673_v30 = vmax.f32 %v611_v22, 0.0 }
 0x2ff   :  { %v676_v28 = vmax.f32 %v622_v24, 0.0 }
 0x300   :  { %v674_v31 = vmax.f32 %v614_v26, 0.0 }
 0x301   :  { %v691_v32 = vpack.c.bf16 %v676_v28, %v675_v27 }
 0x302   :  { %v690_v34 = vpack.c.bf16 %v674_v31, %v673_v30  ;;  %v915_v35 = vpop.f32.mrb[12].mxu1 }
 0x303   :  { %v635_v36 = vadd.f32 %v915_v35, %v464_v17  ;;  %v626_v37 = vpop.f32.mrb[13].mxu1 }
 0x304   :  { %v627_v38 = vadd.f32 %v626_v37, %v454_v15  ;;  %v916_v39 = vpop.f32.mrb[14].mxu1  ;;  %926 = vmatpush3.bf16.msra.mxu1 %v690_v34 }
 0x305   :  { %v638_v40 = vadd.f32 %v916_v39, %v469_v21  ;;  %v629_v41 = vpop.f32.mrb[15].mxu1  ;;  %927 = vmatprep.subr.bf16.mxu1 %v1029_v5  ;;  %v679_v44 = vmax.f32 %v635_v36, 0.0  ;;  %v702_v21 = vpop.permute.xlu1 %701 }
 0x306   :  { %v630_v43 = vadd.f32 %v629_v41, %v459_v16  ;;  %v677_v47 = vmax.f32 %v627_v38, 0.0 }
 0x307   :  { %v680_v45 = vmax.f32 %v638_v40, 0.0 }
 0x308   :  { %v678_v48 = vmax.f32 %v630_v43, 0.0  ;;  %928 = vmatpush3.bf16.msra.mxu1 %v691_v32 }
 0x309   :  { %v693_v49 = vpack.c.bf16 %v680_v45, %v679_v44  ;;  %929 = vmatprep.subr.bf16.mxu1 %v1029_v5 }
 0x30a   :  { %v692_v50 = vpack.c.bf16 %v678_v48, %v677_v47  ;;  %v919_v51 = vpop.f32.mrb[16].mxu1 }
 0x30b   :  { %v651_v52 = vadd.f32 %v919_v51, %v484_v42  ;;  %v642_v53 = vpop.f32.mrb[17].mxu1 }
 0x30c   :  { %v643_v55 = vadd.f32 %v642_v53, %v474_v29  ;;  %v920_v56 = vpop.f32.mrb[18].mxu1  ;;  %930 = vmatpush3.bf16.msra.mxu1 %v692_v50 }
 0x30d   :  { %v654_v57 = vadd.f32 %v920_v56, %v489_v46  ;;  %v645_v58 = vpop.f32.mrb[19].mxu1  ;;  %931 = vmatprep.subr.bf16.mxu1 %v1029_v5  ;;  %v683_v61 = vmax.f32 %v651_v52, 0.0 }
 0x30e   :  { %v646_v60 = vadd.f32 %v645_v58, %v479_v33  ;;  %v681_v63 = vmax.f32 %v643_v55, 0.0 }
 0x30f   :  { %v684_v62 = vmax.f32 %v654_v57, 0.0 }
 0x310   :  { %v682_v0 = vmax.f32 %v646_v60, 0.0  ;;  %932 = vmatpush3.bf16.msra.mxu1 %v693_v49 }
 0x311   :  { %v695_v1 = vpack.c.bf16 %v684_v62, %v683_v61  ;;  %933 = vmatprep.subr.bf16.mxu1 %v1029_v5 }
 0x312   :  { %v694_v3 = vpack.c.bf16 %v682_v0, %v681_v63  ;;  %v923_v4 = vpop.f32.mrb[20].mxu1 }
 0x313   :  { %v667_v6 = vadd.f32 %v923_v4, %v504_v2  ;;  %v658_v7 = vpop.f32.mrb[21].mxu1 }
 0x314   :  { %v659_v9 = vadd.f32 %v658_v7, %v494_v54  ;;  %v924_v10 = vpop.f32.mrb[22].mxu1  ;;  %934 = vmatpush3.bf16.msra.mxu1 %v694_v3 }
 0x315   :  { %v670_v11 = vadd.f32 %v924_v10, %v509_v8  ;;  %v661_v12 = vpop.f32.mrb[23].mxu1  ;;  %935 = vmatprep.subr.bf16.mxu1 %v1029_v5  ;;  %v687_v14 = vmax.f32 %v667_v6, 0.0 }
 0x316   :  { %v662_v13 = vadd.f32 %v661_v12, %v499_v59  ;;  %v685_v16 = vmax.f32 %v659_v9, 0.0 }
 0x317   :  { %v688_v15 = vmax.f32 %v670_v11, 0.0 }
 0x318   :  { %v686_v17 = vmax.f32 %v662_v13, 0.0  ;;  %936 = vmatpush3.bf16.msra.mxu1 %v695_v1 }
 0x319   :  { %v697_v18 = vpack.c.bf16 %v688_v15, %v687_v14  ;;  %937 = vmatprep.subr.bf16.mxu1 %v1029_v5 }
 0x31a   :  { %v696_v19 = vpack.c.bf16 %v686_v17, %v685_v16 }
 0x31c   :  { %938 = vmatpush3.bf16.msra.mxu1 %v696_v19 }
 0x31d   :  { %939 = vmatprep.subr.bf16.mxu1 %v1029_v5 }
 0x320   :  { %940 = vmatpush3.bf16.msra.mxu1 %v697_v18 }
 0x323   :  { %942 = vmatmul.mubr.bf16.vlgmr.msra.gmra.mrb[24].mxu1 %v689_v20 }
 0x3f6   :  { %v738_v22 = vpop.f32.mrb[24].mxu1 }
 0x3f7   :  { %v739_v23 = vadd.f32 %v738_v22, %v702_v21  ;;  %v943_v24 = vpop.f32.mrb[25].mxu1 }
 0x3f8   :  { %v741_v25 = vpop.f32.mrb[26].mxu1 }
 0x3f9   :  { %744 = vst [vmem:[#allocation2] sm:$0x3] %v739_v23  ;;  %v944_v26 = vpop.f32.mrb[27].mxu1 }
 0x3fa   :  { %1014 = shalt.err (!%p1011_p4)
}
 0x3fb   :  { %s1015_s10 = scalar_lea.hbm %s1344_s9, 32 }
 0x3fc   :  { %p1016_p5 = scmp.ne.s32.totalorder %s1344_s9, %s1015_s10  ;;  %p1019_p6 = scmp.lt.u32.totalorder %s1015_s10, %s1344_s9 }
 0x3fe   :  { %p1021_p7 = pnand %p1019_p6, %p1016_p5 }
 0x400   :  { %1024 = shalt.err (!%p1021_p7)
}
 0x401   :  { %754 = dma.vmem_to_hbm [thread:$0]  %s752_s8, 32, %s1344_s9, [#allocation3]  }
 0x402   :  { %1025 = dma.done.wait [#allocation3], 32  }
 0x403   :  { %1026 = vsyncadd [#allocation3], 4294967264 }
 0x404   :  { %758 = vsyncpa [#allocation3], 1 }

</bundles_post_ra>
